<compile_context>
chip_gen: v5e
topology: v5e:2x2
jax: 0.10.0
libtpu: 0.0.40
codegen_flags: <defaults>
</compile_context>

<pallas_src>
import math

import jax
import jax.numpy as jnp
from jax.experimental import pallas as pl
from jax.experimental.pallas import tpu as pltpu


_SQRT_2_OVER_PI = 0.7978845608028654


def _gelu_tanh(x):
    # Matches torch.nn.GELU(approximate='tanh'):
    #   0.5*x*(1 + tanh(sqrt(2/pi)*(x + 0.044715*x^3)))
    # rewritten as x*(0.5 + 0.5*tanh(sqrt(2/pi)*x*(1 + 0.044715*x^2)))
    # to compute x^2 once and fold the 0.5/(1+..) constants (fewer VALU ops).
    x_sq = x * x
    u = (_SQRT_2_OVER_PI * x) * (1.0 + 0.044715 * x_sq)
    return x * (0.5 + 0.5 * jnp.tanh(u))


def _round_up(a, b):
    return (a + b - 1) // b * b


def _tpu_hw_info():
    """(vmem_capacity_bytes, tensorcores) with conservative fallbacks."""
    vmem_cap = 64 << 20  # conservative (v7x-sized) default if query fails
    cores = 2
    try:
        info = pltpu.get_tpu_info()
        cap = getattr(info, "vmem_capacity_bytes", None)
        if cap:
            vmem_cap = int(cap)
        c = getattr(info, "num_cores", None) or getattr(info, "tensor_cores_per_chip", None)
        if c:
            cores = int(c)
        else:
            # 64 MiB per-core VMEM is the v7x signature (2 TCs/chip).
            cores = 2 if vmem_cap <= (64 << 20) else 1
    except Exception:
        pass
    return vmem_cap, cores


def mlp_kernel(x_ref, wfc_ref, bfc_ref, wproj_ref, bproj_ref, o_ref, acc_ref):
    # x_ref:     (tm, n_embd)          wfc_ref:   (n_embd, th)
    # bfc_ref:   (1, th)               wproj_ref: (th, n_embd)
    # bproj_ref: (1, n_embd)           o_ref:     (tm, n_embd)
    # acc_ref:   (tm, n_embd) f32 VMEM scratch, persists across the hidden axis.
    j = pl.program_id(1)

    @pl.when(j == 0)
    def _():
        acc_ref[...] = jnp.zeros_like(acc_ref)

    # First matmul on this hidden slice; MXU accumulates in f32.
    h = jnp.dot(x_ref[...], wfc_ref[...], preferred_element_type=jnp.float32)
    h = h + bfc_ref[...].astype(jnp.float32)
    h = _gelu_tanh(h)  # f32 VPU/EUP math on the accumulator dtype.

    # Second matmul for this hidden slice, accumulated into the output tile.
    acc_ref[...] += jnp.dot(h.astype(wproj_ref.dtype), wproj_ref[...],
                            preferred_element_type=jnp.float32)

    @pl.when(j == pl.num_programs(1) - 1)
    def _():
        y = acc_ref[...] + bproj_ref[...].astype(jnp.float32)
        o_ref[...] = y.astype(o_ref.dtype)


def _vmem_bytes(tm, th, n_embd, hidden, in_isz, w_isz):
    """Rough VMEM footprint for one pipelined grid step."""
    io_bytes = 2 * 2 * tm * n_embd * in_isz                       # x + out tiles, double-buffered
    wgt_bytes = 2 * w_isz * (n_embd * th + th * n_embd + th + n_embd)  # weight/bias slices (2 bufs)
    acc_bytes = 4 * tm * n_embd                                   # f32 accumulator scratch
    tmp_bytes = 3 * 4 * tm * th                                   # f32 GELU intermediate + temporaries
    return io_bytes + wgt_bytes + acc_bytes + tmp_bytes


def mlp_pallas(x, w_fc, b_fc, w_proj, b_proj, *, tm=None, th=None):
    """x: [B, T, n_embd] -> [B, T, n_embd]."""
    B, T, n_embd = x.shape
    hidden = w_fc.shape[1]
    M = B * T

    in_isz = jnp.dtype(x.dtype).itemsize
    w_isz = jnp.dtype(w_fc.dtype).itemsize

    vmem_cap, num_cores = _tpu_hw_info()
    big_vmem = vmem_cap >= (100 << 20)          # v5e / v6e (128 MiB physical)
    vmem_budget = (104 << 20) if big_vmem else (52 << 20)

    # Sublane multiple for the activation dtype (8 f32, 16 bf16, 32 int8/fp8).
    sub = {4: 8, 2: 16, 1: 32}.get(in_isz, 8)

    explicit_tm = tm is not None
    explicit_th = th is not None

    # ---- Row tile selection (arithmetic intensity lever) ----
    if not explicit_tm:
        if big_vmem:
            tm = 1024 if in_isz <= 2 else 512   # v5e/v6e
        else:
            tm = 512 if in_isz <= 2 else 384    # v7x
    tm = max(sub, _round_up(min(tm, _round_up(M, sub)), sub))

    # v7x megacore: make sure there are at least `num_cores` row tiles.
    if not explicit_tm and num_cores > 1:
        while tm > sub and (M + tm - 1) // tm < num_cores:
            new_tm = max(sub, _round_up(tm // 2, sub))
            if new_tm == tm:
                break
            tm = new_tm

    # ---- Hidden tile selection: prefer th = hidden (weight-resident) ----
    if explicit_th:
        th_candidates = [th]
    else:
        th_candidates = [hidden] + [t for t in (512, 256, 128)
                                    if t < hidden and hidden % t == 0]

    sel_th = None
    while True:
        for t in th_candidates:
            if _vmem_bytes(tm, t, n_embd, hidden, in_isz, w_isz) <= vmem_budget:
                sel_th = t
                break
        if sel_th is not None or explicit_tm or tm <= sub:
            break
        tm = max(sub, _round_up(tm // 2, sub))
    if sel_th is None:
        sel_th = th_candidates[-1]  # best effort
    th = sel_th

    assert th == hidden or th % 128 == 0, "hidden tile must be lane-aligned"
    assert hidden % th == 0, "hidden must be divisible by the hidden tile"

    M_pad = _round_up(M, tm)

    x2 = x.reshape(M, n_embd)
    if M_pad != M:
        x2 = jnp.pad(x2, ((0, M_pad - M), (0, 0)))
    b_fc2 = b_fc.reshape(1, hidden)
    b_proj2 = b_proj.reshape(1, n_embd)

    grid = (M_pad // tm, hidden // th)
    n_row_tiles = grid[0]

    est = _vmem_bytes(tm, th, n_embd, hidden, in_isz, w_isz)
    vmem_limit = int(min(vmem_cap - (8 << 20),
                         max(vmem_budget, int(1.25 * est) + (4 << 20))))
    vmem_limit = max(vmem_limit, 32 << 20)

    # Weights are streamed once per row tile on the tiled path, once total on
    # the resident (th == hidden) path.
    weight_bytes = (w_fc.size * w_fc.dtype.itemsize
                    + w_proj.size * w_proj.dtype.itemsize
                    + b_fc.size * b_fc.dtype.itemsize
                    + b_proj.size * b_proj.dtype.itemsize)
    w_streams = 1 if th == hidden else n_row_tiles
    cost = pl.CostEstimate(
        flops=4 * M * n_embd * hidden,          # two matmuls
        transcendentals=M * hidden,             # tanh in GELU
        bytes_accessed=(x2.size * x2.dtype.itemsize
                        + M_pad * n_embd * jnp.dtype(x.dtype).itemsize
                        + w_streams * weight_bytes))

    out = pl.pallas_call(
        mlp_kernel,
        out_shape=jax.ShapeDtypeStruct((M_pad, n_embd), x.dtype),
        grid_spec=pltpu.PrefetchScalarGridSpec(
            num_scalar_prefetch=0,
            grid=grid,
            in_specs=[
                pl.BlockSpec((tm, n_embd), lambda i, j: (i, 0)),     # x tile
                pl.BlockSpec((n_embd, th), lambda i, j: (0, j)),     # W_fc slice
                pl.BlockSpec((1, th), lambda i, j: (0, j)),          # b_fc slice
                pl.BlockSpec((th, n_embd), lambda i, j: (j, 0)),     # W_proj slice
                pl.BlockSpec((1, n_embd), lambda i, j: (0, 0)),      # b_proj
            ],
            out_specs=pl.BlockSpec((tm, n_embd), lambda i, j: (i, 0)),
            scratch_shapes=[pltpu.VMEM((tm, n_embd), jnp.float32)],
        ),
        compiler_params=pltpu.CompilerParams(
            dimension_semantics=("parallel", "arbitrary"),
            vmem_limit_bytes=vmem_limit),
        cost_estimate=cost,
    )(x2, w_fc, b_fc2, w_proj, b_proj2)

    if M_pad != M:
        out = out[:M]
    return out.reshape(B, T, n_embd)


def mlp_reference(x, w_fc, b_fc, w_proj, b_proj):
    x = x.astype(jnp.float32)
    h = jnp.dot(x, w_fc.astype(jnp.float32)) + b_fc.astype(jnp.float32)
    c = _SQRT_2_OVER_PI
    h = 0.5 * h * (1.0 + jnp.tanh(c * (h + 0.044715 * h * h * h)))
    return jnp.dot(h, w_proj.astype(jnp.float32)) + b_proj.astype(jnp.float32)


def _make_params(key, n_embd, hidden, dtype):
    k_wfc, k_bfc, k_wp, k_bp = jax.random.split(key, 4)
    bound_fc = 1.0 / math.sqrt(n_embd)
    bound_pj = 1.0 / math.sqrt(hidden)
    w_fc = jax.random.uniform(k_wfc, (n_embd, hidden), jnp.float32,
                              minval=-bound_fc, maxval=bound_fc).astype(dtype)
    b_fc = jax.random.uniform(k_bfc, (hidden,), jnp.float32,
                              minval=-bound_fc, maxval=bound_fc).astype(dtype)
    w_proj = jax.random.uniform(k_wp, (hidden, n_embd), jnp.float32,
                                minval=-bound_pj, maxval=bound_pj).astype(dtype)
    b_proj = jax.random.uniform(k_bp, (n_embd,), jnp.float32,
                                minval=-bound_pj, maxval=bound_pj).astype(dtype)
    return w_fc, b_fc, w_proj, b_proj


if __name__ == "__main__":
    key = jax.random.PRNGKey(0)

    # --- Test 1: tiny GPT-2-like config in f32 (n_embd=32 -> hidden=128) ---
    B, T, n_embd = 2, 8, 32
    hidden = 4 * n_embd
    k_x, k_p = jax.random.split(key)
    w_fc, b_fc, w_proj, b_proj = _make_params(k_p, n_embd, hidden, jnp.float32)
    x = jax.random.normal(k_x, (B, T, n_embd), jnp.float32)

    out = jax.block_until_ready(mlp_pallas(x, w_fc, b_fc, w_proj, b_proj))
    ref = mlp_reference(x, w_fc, b_fc, w_proj, b_proj)
    assert out.shape == (B, T, n_embd)
    assert jnp.allclose(out, ref, atol=1e-4, rtol=1e-4), "f32 mismatch vs reference"

    # --- Test 2: bf16 operands, auto tile selection (weight-resident path) ---
    B2, T2, n_embd2 = 2, 192, 128     # M = 384
    hidden2 = 4 * n_embd2             # 512
    k_x2, k_p2 = jax.random.split(jax.random.PRNGKey(1))
    w_fc2, b_fc2, w_proj2, b_proj2 = _make_params(k_p2, n_embd2, hidden2, jnp.bfloat16)
    x2 = jax.random.normal(k_x2, (B2, T2, n_embd2), jnp.bfloat16)

    out2 = jax.block_until_ready(mlp_pallas(x2, w_fc2, b_fc2, w_proj2, b_proj2))
    ref2 = mlp_reference(x2, w_fc2, b_fc2, w_proj2, b_proj2)
    assert out2.shape == (B2, T2, n_embd2)
    assert jnp.allclose(out2.astype(jnp.float32), ref2, atol=5e-2, rtol=5e-2), \
        "bf16 mismatch vs f32 reference (auto tiles)"

    # --- Test 3: same bf16 data, explicit tiles to exercise the hidden-axis
    #     grid reduction (grid = (3, 2)) and row padding. ---
    out3 = jax.block_until_ready(
        mlp_pallas(x2, w_fc2, b_fc2, w_proj2, b_proj2, tm=128, th=256))
    assert out3.shape == (B2, T2, n_embd2)
    assert jnp.allclose(out3.astype(jnp.float32), ref2, atol=5e-2, rtol=5e-2), \
        "bf16 mismatch vs f32 reference (tiled hidden axis)"

    print("KERNEL_OK")
</pallas_src>

<mosaic_0001>
module attributes {stable_mosaic.version = 11 : i64} {
  func.func @mlp_kernel(%arg0: i32, %arg1: i32, %arg2: memref<8x32xf32, #tpu.memory_space<vmem>>, %arg3: memref<32x128xf32, #tpu.memory_space<vmem>>, %arg4: memref<1x128xf32, #tpu.memory_space<vmem>>, %arg5: memref<128x32xf32, #tpu.memory_space<vmem>>, %arg6: memref<1x32xf32, #tpu.memory_space<vmem>>, %arg7: memref<8x32xf32, #tpu.memory_space<vmem>>, %arg8: memref<8x32xf32, #tpu.memory_space<vmem>>) attributes {dimension_semantics = [#tpu.dimension_semantics<parallel>, #tpu.dimension_semantics<arbitrary>], iteration_bounds = array<i64: 2, 1>, scalar_prefetch = 0 : i64, scratch_operands = 1 : i64, tpu.core_type = #tpu.core_type<tc>, window_params = [{transform_indices = @transform_0, window_bounds = array<i64: 8, 32>}, {transform_indices = @transform_1, window_bounds = array<i64: 32, 128>}, {transform_indices = @transform_2, window_bounds = array<i64: 1, 128>}, {transform_indices = @transform_3, window_bounds = array<i64: 128, 32>}, {pipeline_mode = #tpu.pipeline_mode<synchronous>, transform_indices = @transform_4, window_bounds = array<i64: 1, 32>}, {transform_indices = @transform_5, window_bounds = array<i64: 8, 32>}]} {
    %c0_i32 = arith.constant 0 : i32
    %0 = arith.cmpi eq, %arg1, %c0_i32 : i32
    %1 = arith.extui %0 : i1 to i32
    %c0_i32_0 = arith.constant 0 : i32
    %2 = arith.cmpi ne, %1, %c0_i32_0 : i32
    scf.if %2 {
      %cst_20 = arith.constant 0.000000e+00 : f32
      %31 = vector.broadcast %cst_20 : f32 to vector<8x32xf32>
      %c0_21 = arith.constant 0 : index
      %c0_22 = arith.constant 0 : index
      %32 = vector.load %arg8[%c0_21, %c0_22] : memref<8x32xf32, #tpu.memory_space<vmem>>, vector<8x32xf32>
      tpu.vector_store %arg8[%c0_21, %c0_22], %31 {strides = array<i32>} : memref<8x32xf32, #tpu.memory_space<vmem>>, vector<8x32xf32>,
    } else {
    }
    %c0 = arith.constant 0 : index
    %c0_1 = arith.constant 0 : index
    %3 = vector.load %arg2[%c0, %c0_1] : memref<8x32xf32, #tpu.memory_space<vmem>>, vector<8x32xf32>
    %c0_2 = arith.constant 0 : index
    %c0_3 = arith.constant 0 : index
    %4 = vector.load %arg3[%c0_2, %c0_3] : memref<32x128xf32, #tpu.memory_space<vmem>>, vector<32x128xf32>
    %cst = arith.constant dense<0.000000e+00> : vector<8x128xf32>
    %5 = tpu.matmul %3, %4, %cst {dimension_numbers = #tpu.dot_dimension_numbers<[1], [0], [0], [1], [0, 0, 1, 1], [], []>} : vector<8x32xf32>, vector<32x128xf32>, vector<8x128xf32> -> vector<8x128xf32>
    %c0_4 = arith.constant 0 : index
    %c0_5 = arith.constant 0 : index
    %6 = vector.load %arg4[%c0_4, %c0_5] : memref<1x128xf32, #tpu.memory_space<vmem>>, vector<1x128xf32>
    %7 = vector.broadcast %6 : vector<1x128xf32> to vector<8x128xf32>
    %8 = arith.addf %5, %7 : vector<8x128xf32>
    %9 = arith.mulf %8, %8 : vector<8x128xf32>
    %cst_6 = arith.constant 0.797884583 : f32
    %10 = vector.broadcast %cst_6 : f32 to vector<8x128xf32>
    %11 = arith.mulf %10, %8 : vector<8x128xf32>
    %cst_7 = arith.constant 4.471500e-02 : f32
    %12 = vector.broadcast %cst_7 : f32 to vector<8x128xf32>
    %13 = arith.mulf %12, %9 : vector<8x128xf32>
    %cst_8 = arith.constant 1.000000e+00 : f32
    %14 = vector.broadcast %cst_8 : f32 to vector<8x128xf32>
    %15 = arith.addf %14, %13 : vector<8x128xf32>
    %16 = arith.mulf %11, %15 : vector<8x128xf32>
    %17 = math.tanh %16 : vector<8x128xf32>
    %cst_9 = arith.constant 5.000000e-01 : f32
    %18 = vector.broadcast %cst_9 : f32 to vector<8x128xf32>
    %19 = arith.mulf %18, %17 : vector<8x128xf32>
    %cst_10 = arith.constant 5.000000e-01 : f32
    %20 = vector.broadcast %cst_10 : f32 to vector<8x128xf32>
    %21 = arith.addf %20, %19 : vector<8x128xf32>
    %22 = arith.mulf %8, %21 : vector<8x128xf32>
    %c0_11 = arith.constant 0 : index
    %c0_12 = arith.constant 0 : index
    %23 = vector.load %arg8[%c0_11, %c0_12] : memref<8x32xf32, #tpu.memory_space<vmem>>, vector<8x32xf32>
    %c0_13 = arith.constant 0 : index
    %c0_14 = arith.constant 0 : index
    %24 = vector.load %arg5[%c0_13, %c0_14] : memref<128x32xf32, #tpu.memory_space<vmem>>, vector<128x32xf32>
    %cst_15 = arith.constant dense<0.000000e+00> : vector<8x32xf32>
    %25 = tpu.matmul %22, %24, %cst_15 {dimension_numbers = #tpu.dot_dimension_numbers<[1], [0], [0], [1], [0, 0, 1, 1], [], []>} : vector<8x128xf32>, vector<128x32xf32>, vector<8x32xf32> -> vector<8x32xf32>
    %26 = arith.addf %23, %25 : vector<8x32xf32>
    %c0_16 = arith.constant 0 : index
    %c0_17 = arith.constant 0 : index
    %27 = vector.load %arg8[%c0_16, %c0_17] : memref<8x32xf32, #tpu.memory_space<vmem>>, vector<8x32xf32>
    tpu.vector_store %arg8[%c0_16, %c0_17], %26 {strides = array<i32>} : memref<8x32xf32, #tpu.memory_space<vmem>>, vector<8x32xf32>,
    %c0_i32_18 = arith.constant 0 : i32
    %28 = arith.cmpi eq, %arg1, %c0_i32_18 : i32
    %29 = arith.extui %28 : i1 to i32
    %c0_i32_19 = arith.constant 0 : i32
    %30 = arith.cmpi ne, %29, %c0_i32_19 : i32
    scf.if %30 {
      %c0_20 = arith.constant 0 : index
      %c0_21 = arith.constant 0 : index
      %31 = vector.load %arg8[%c0_20, %c0_21] : memref<8x32xf32, #tpu.memory_space<vmem>>, vector<8x32xf32>
      %c0_22 = arith.constant 0 : index
      %c0_23 = arith.constant 0 : index
      %32 = vector.load %arg6[%c0_22, %c0_23] : memref<1x32xf32, #tpu.memory_space<vmem>>, vector<1x32xf32>
      %33 = vector.broadcast %32 : vector<1x32xf32> to vector<8x32xf32>
      %34 = arith.addf %31, %33 : vector<8x32xf32>
      %c0_24 = arith.constant 0 : index
      %c0_25 = arith.constant 0 : index
      %35 = vector.load %arg7[%c0_24, %c0_25] : memref<8x32xf32, #tpu.memory_space<vmem>>, vector<8x32xf32>
      tpu.vector_store %arg7[%c0_24, %c0_25], %34 {strides = array<i32>} : memref<8x32xf32, #tpu.memory_space<vmem>>, vector<8x32xf32>,
    } else {
    }
    return
  }
  func.func @transform_0(%arg0: i32, %arg1: i32) -> (i32, i32) {
    %c0_i32 = arith.constant 0 : i32
    %c0_i32_0 = arith.constant 0 : i32
    return %arg0, %c0_i32 : i32, i32
  }
  func.func @transform_1(%arg0: i32, %arg1: i32) -> (i32, i32) {
    %c0_i32 = arith.constant 0 : i32
    %c0_i32_0 = arith.constant 0 : i32
    return %c0_i32, %arg1 : i32, i32
  }
  func.func @transform_2(%arg0: i32, %arg1: i32) -> (i32, i32) {
    %c0_i32 = arith.constant 0 : i32
    %c0_i32_0 = arith.constant 0 : i32
    return %c0_i32, %arg1 : i32, i32
  }
  func.func @transform_3(%arg0: i32, %arg1: i32) -> (i32, i32) {
    %c0_i32 = arith.constant 0 : i32
    %c0_i32_0 = arith.constant 0 : i32
    return %arg1, %c0_i32 : i32, i32
  }
  func.func @transform_4(%arg0: i32, %arg1: i32) -> (i32, i32) {
    %c0_i32 = arith.constant 0 : i32
    %c0_i32_0 = arith.constant 0 : i32
    %c0_i32_1 = arith.constant 0 : i32
    return %c0_i32, %c0_i32_0 : i32, i32
  }
  func.func @transform_5(%arg0: i32, %arg1: i32) -> (i32, i32) {
    %c0_i32 = arith.constant 0 : i32
    %c0_i32_0 = arith.constant 0 : i32
    return %arg0, %c0_i32 : i32, i32
  }
}

</mosaic_0001>

<bundles_post_ra>
// kernel: tpu_custom_call.1
= control target key start
LH: loop header
LB: loop body
LE: loop exit
PB: predicated region body
PF: predicated region fallthrough
CT: control target
= control target key end

     0   :  { %10 = vsyncpa [#allocation4], 0  ;;  %s860_s0 = inlined_call_operand.vmem [shape: f32[16,32], index: 0, kind: input, shape index: {}]   ;;  %s861_s1 = inlined_call_operand.vmem [shape: f32[32,128], index: 1, kind: input, shape index: {}]   ;;  %s862_s2 = inlined_call_operand.vmem [shape: f32[1,128], index: 2, kind: input, shape index: {}]   ;;  %s863_s3 = inlined_call_operand.vmem [shape: f32[128,32], index: 3, kind: input, shape index: {}]   ;;  %s864_s4 = inlined_call_operand.vmem [shape: f32[1,32], index: 4, kind: input, shape index: {}]   ;;  %s865_s5 = inlined_call_operand.hbm [shape: f32[16,32], index: 5, kind: output, shape index: {}]  }
   0x1   :  { %12 = vsyncpa [#allocation4 + $0x1], 0  ;;  %s693_s18 = smov 0   ;;  %s695_s19 = smov 0  }
   0x2   :  { %s697_s20 = smov 0   ;;  %s699_s21 = smov 0  }
   0x3   :  { %s701_s22 = smov 0   ;;  %s703_s23 = smov 0  }
   0x4 LB: > { %s507_s24 = sadd.s32 4294967295, %s660_s23   ;;  %s508_s25 = sadd.s32 4294967294, %s660_s23   ;;  %s660_s23 = sphi %s703_s23, %s18_s23   ;;  %s656_s22 = sphi %s701_s22, %s872_s22   ;;  %s652_s21 = sphi %s699_s21, %s871_s21   ;;  %s648_s20 = sphi %s697_s20, %s870_s20   ;;  %s644_s19 = sphi %s695_s19, %s869_s19   ;;  %s640_s18 = sphi %s693_s18, %s868_s18  }
   0x5   : > { %s30_s26 = sadd.s32 1, %s656_s22  ;;  %s162_s27 = sadd.s32 1, %s648_s20 }
   0x6   : > { %p32_p0 = scmp.ge.s32.totalorder %s30_s26, 2  ;;  %p172_p1 = scmp.ne.s32.totalorder %s648_s20, %s644_s19 }
   0x7   : > { %p173_p2 = scmp.eq.s32.totalorder %s507_s24, 1  ;;  %p178_p3 = scmp.ne.s32.totalorder %s644_s19, %s640_s18 }
   0x8   : > { %s874_s26 = smov (%p32_p0, %s30_s26), 0  ;;  %p179_p5 = scmp.eq.s32.totalorder %s508_s25, 1 }
   0x9   : > { %p733_p4 = por %p173_p2, %p172_p1  ;;  %s159_s29 = ssub.s32 %s656_s22, %s874_s26 }
   0xa   : > { %p514_p6 = scmp.ge.s32.totalorder %s660_s23, 1  ;;  %p160_p7 = scmp.eq.s32.totalorder %s159_s29, 0 }
   0xb   : > { %p740_p8 = por %p179_p5, %p178_p3  ;;  %p229_p9 = scmp.lt.s32.totalorder %s660_s23, 3 }
   0xc   : > { %s746_s6 = scalar_select %p160_p7, %s648_s20, %s162_s27  }
   0xd   : > { %p230_p10 = pnand %p514_p6, %p229_p9 }
   0xe   : > { %p268_p11 = scmp.lt.s32.totalorder (!%p230_p10), %s652_s21, 1  ;;  %s265_s9 = sand.u32 (!%p230_p10), 1, %s644_s19  }
   0xf   : > { %233 = sbr.rel (%p230_p10) target bundleno = 318 (0x13e), region = 40  ;;  %s519_s11 = sshll.u32 (!%p230_p10), %s652_s21, 3 }
  0x10   : > { %s393_s14 = scalar_lea.hbm (!%p230_p10), %s865_s5, %s519_s11 }
  0x11   : > { %s397_s25 = sshll.u32 (!%p230_p10), %s393_s14, 4  ;;  %s398_s25 = int_to_ptr.hbm [resolvable:$true] %s397_s25 }
  0x12   : > { %s596_s27 = sshra.s32 (!%p230_p10), %s398_s25, 4  ;;  %s597_s27 = int_to_ptr.hbm [resolvable:$true] %s596_s27 }
  0x13   : > { %s598_s29 = scalar_lea.hbm (!%p230_p10), %s597_s27, 8  ;;  %p603_p1 = scmp.lt.s32.totalorder (!%p230_p10), %s597_s27, %s865_s5 }
  0x14   : > { %v295_v0 = vld [vmem:[%s861_s1 + $0x18] sm:$0xff]  ;;  %v294_v1 = vld [vmem:[%s861_s1 + $0x10] sm:$0xff]  ;;  %vm289_vm0 = vcmask 261120   ;;  %v662_v2 = vmov 0.0   ;;  %v293_v5 = vld [vmem:[%s861_s1 + $0x8] sm:$0xff]  ;;  %s269_s17 = scalar_select %p268_p11, %s652_s21, 1 }
  0x15   : > { %316 = vmatpush.msra.mxu0 %v295_v0  ;;  %290 = vst.msk [vmem:[#allocation2] sm:$0xff] %vm289_vm0, %v662_v2  ;;  %v349_v3 = vld [vmem:[%s863_s3 + $0x78] sm:$0xff]  ;;  %v348_v4 = vld [vmem:[%s863_s3 + $0x70] sm:$0xff]  ;;  %v347_v6 = vld [vmem:[%s863_s3 + $0x68] sm:$0xff]  ;;  %s383_s21 = scalar_lea.sflag [#allocation4], %s265_s9  ;;  %p599_p12 = scmp.ne.s32.totalorder %s597_s27, %s598_s29 }
  0x16   : > { %350 = vmatpush.msra.mxu1 %v349_v3  ;;  %v292_v7 = vld [vmem:[%s861_s1] sm:$0xff]  ;;  %s516_s7 = sshll.u32 %s269_s17, 3  ;;  %v345_v10 = vld [vmem:[%s863_s3 + $0x58] sm:$0xff]  ;;  %v344_v11 = vld [vmem:[%s863_s3 + $0x50] sm:$0xff] }
  0x17   : > { %317 = vmatpush.msra.mxu0 %v294_v1  ;;  %s271_s10 = scalar_lea.vmem %s860_s0, %s516_s7  ;;  %v346_v8 = vld [vmem:[%s863_s3 + $0x60] sm:$0xff]  ;;  %v343_v12 = vld [vmem:[%s863_s3 + $0x48] sm:$0xff]  ;;  %v341_v14 = vld [vmem:[%s863_s3 + $0x38] sm:$0xff]  ;;  %p600_p13 = pnand %p599_p12, %p733_p4 }
  0x18   : > { %351 = vmatpush.msra.mxu1 %v348_v4  ;;  %v291_v9 = vld [vmem:[%s271_s10] sm:$0xff]  ;;  %v340_v15 = vld [vmem:[%s863_s3 + $0x30] sm:$0xff]  ;;  %v339_v16 = vld [vmem:[%s863_s3 + $0x28] sm:$0xff]  ;;  %s515_s10 = sshll.u32 %s265_s9, 3 }
  0x19   : > { %318 = vmatpush.msra.mxu0 %v293_v5  ;;  %v342_v13 = vld [vmem:[%s863_s3 + $0x40] sm:$0xff]  ;;  %v337_v18 = vld [vmem:[%s863_s3 + $0x18] sm:$0xff]  ;;  %v336_v19 = vld [vmem:[%s863_s3 + $0x10] sm:$0xff]  ;;  %s267_s17 = scalar_lea.vmem [#allocation3], %s515_s10  ;;  %p601_p0 = pneg %p600_p13 }
  0x1a   : > { %352 = vmatpush.msra.mxu1 %v347_v6  ;;  %v338_v17 = vld [vmem:[%s863_s3 + $0x20] sm:$0xff]  ;;  %v335_v20 = vld [vmem:[%s863_s3 + $0x8] sm:$0xff]  ;;  %s395_s24 = sshll.u32 %s267_s17, 4  ;;  %s602_s10 = scalar_lea.hbm %s865_s5, 16  ;;  %s396_s24 = int_to_ptr.vmem [resolvable:$true] %s395_s24 }
  0x1b   : > { %319 = vmatpush.msra.mxu0 %v292_v7  ;;  %v334_v21 = vld [vmem:[%s863_s3] sm:$0xff]  ;;  %p604_p2 = scmp.lt.s32.totalorder %s602_s10, %s598_s29 }
  0x1c   : > { %517 = vmatmul.msk.f32.vlgmr.msra.gmra.mxu0 %vm289_vm0, %v291_v9  ;;  %353 = vmatpush.msra.mxu1 %v346_v8  ;;  %v578_v22 = vld [vmem:[%s862_s2] ss:$0 sm:$0xff] }
  0x1d   : > { %v333_v34 = vld [vmem:[#allocation2] sm:$0xff]  ;;  %p605_p3 = por %p604_p2, %p603_p1 }
  0x1e   : > { %354 = vmatpush.msra.mxu1 %v345_v10  ;;  %v579_v37 = vld [vmem:[%s864_s4] ss:$0 sm:$0xff] }
  0x1f   : > { %p606_p5 = pnand %p605_p3, %p601_p0 }
  0x20   : > { %355 = vmatpush.msra.mxu1 %v344_v11 }
  0x22   : > { %356 = vmatpush.msra.mxu1 %v343_v12 }
  0x24   : > { %357 = vmatpush.msra.mxu1 %v342_v13 }
  0x26   : > { %358 = vmatpush.msra.mxu1 %v341_v14 }
  0x28   : > { %359 = vmatpush.msra.mxu1 %v340_v15 }
  0x2a   : > { %360 = vmatpush.msra.mxu1 %v339_v16 }
  0x2c   : > { %361 = vmatpush.msra.mxu1 %v338_v17 }
  0x2e   : > { %362 = vmatpush.msra.mxu1 %v337_v18 }
  0x30   : > { %363 = vmatpush.msra.mxu1 %v336_v19 }
  0x32   : > { %364 = vmatpush.msra.mxu1 %v335_v20 }
  0x34   : > { %365 = vmatpush.msra.mxu1 %v334_v21 }
  0x99   : > { %v321_v23 = vpop.f32.mrf.mxu0 }
  0x9a   : > { %v322_v24 = vadd.f32 %v578_v22, %v321_v23 }
  0x9c   : > { %v324_v25 = vmul.f32 %v322_v24, %v322_v24  ;;  %v325_v27 = vmul.f32 0.7978846, %v322_v24 }
  0x9e   : > { %v326_v26 = vmul.f32 0.044715, %v324_v25 }
  0xa0   : > { %v327_v28 = vadd.f32 1.0, %v326_v26 }
  0xa2   : > { %v328_v29 = vmul.f32 %v327_v28, %v325_v27 }
  0xa4   : > { %580 = vtanh.f32 %v328_v29 }
  0xaa   : > { %v581_v30 = vpop.eup %580 }
  0xab   : > { %v330_v31 = vmul.f32 0.5, %v581_v30 }
  0xad   : > { %v331_v32 = vadd.f32 0.5, %v330_v31 }
  0xaf   : > { %v332_v33 = vmul.f32 %v331_v32, %v322_v24 }
  0xb1   : > { %366 = vmatmul.f32.vlgmr.msra.gmra.mxu1 %v332_v33 }
 0x12e   : > { %v367_v35 = vpop.f32.mrf.mxu1 }
 0x12f   : > { %v370_v36 = vadd.f32 %v367_v35, %v333_v34 }
 0x131   : > { %371 = vst.msk [vmem:[#allocation2] sm:$0xff] %vm289_vm0, %v370_v36 }
 0x138   : > { %v375_v38 = vld [vmem:[#allocation2] sm:$0xff] }
 0x139   : > { %v380_v39 = vadd.f32 %v579_v37, %v375_v38 }
 0x13b   : > { %381 = vst.msk [vmem:[%s267_s17] sm:$0xff] %vm289_vm0, %v380_v39 }
 0x13c   : > { %609 = shalt.err (!%p606_p5)
}
 0x13d   : > { %522 = dma.vmem_to_hbm [thread:$0]  (%p733_p4), %s396_s24, 128, %s398_s25, %s383_s21  }
 0x13e PF: > { %p528_p6 = scmp.ge.s32.totalorder %s660_s23, 2  ;;  %s409_s9 = sand.u32 1, %s640_s18  }
 0x13f   : > { %s410_s13 = scalar_lea.sflag [#allocation4], %s409_s9 }
 0x140   : > { %p525_p7 = pnand %p528_p6, %p740_p8 }
 0x142   : > { %p526_p9 = pneg %p525_p7 }
 0x144   : > { %635 = dma.done.wait (%p526_p9), %s410_s13, 128  }
 0x145   : > { %637 = vsyncadd (%p526_p9), %s410_s13, 4294967168  ;;  %s18_s23 = sadd.s32 1, %s660_s23   ;;  %s868_s18 = smov %s644_s19 }
 0x146   : > { %p15_p10 = scmp.ge.s32.totalorder %s18_s23, 4   ;;  %s869_s19 = smov %s648_s20 }
 0x147   : > { %s870_s20 = smov %s746_s6  ;;  %s871_s21 = smov %s656_s22 }
 0x148   : > { %s872_s22 = smov %s874_s26  ;;  %17 = sbr.rel (!%p15_p10) target bundleno = 4 (0x4), region = 92 }
 0x14d   :  { %416 = vsyncpa [#allocation4], 1 }
 0x14e   :  { %418 = vsyncpa [#allocation4 + $0x1], 1 }

</bundles_post_ra>
